<compile_context>
chip_gen: v5e
topology: v5e:2x2
jax: 0.10.0
libtpu: 0.0.40
codegen_flags: <defaults>
</compile_context>

<pallas_src>
import jax
import jax.numpy as jnp
from jax.experimental import pallas as pl
from jax.experimental.pallas import tpu as pltpu

IN_FEATURES = 10
HIDDEN_SIZE = 500      # PyTorch module default hidden_size
OUT_FEATURES = 2

HIDDEN_PAD = 512       # 500 -> 512: full lane groups for bias/ReLU and K of matmul 2
W2_LANE_PAD = 128      # W2 kept lane-dense in VMEM; only 2 result columns are stored


def mlp_kernel(x_ref, w1_ref, b1_ref, w2_ref, b2_ref, o_ref):
    # Hidden layer: h = relu(x @ W1 + b1)  (MXU, f32 accumulation; bias/ReLU in f32)
    h = jnp.dot(x_ref[...], w1_ref[...], preferred_element_type=jnp.float32)
    h = jnp.maximum(h + b1_ref[...], 0.0)             # b1 is (1, HIDDEN_PAD), broadcast over rows
    # Output layer: y = h @ W2 + b2 ; output_activation is None -> identity.
    # Cast h to the weight dtype so the second matmul also runs the bf16 MXU path.
    y = jnp.dot(h.astype(w2_ref.dtype), w2_ref[...],
                preferred_element_type=jnp.float32)
    # Store only the 2 live columns -> 8 B/row of HBM writeback instead of 512 B/row.
    o_ref[...] = (y[:, :OUT_FEATURES] + b2_ref[...]).astype(o_ref.dtype)


def prepare_params(w1, b1, w2, b2, *, param_dtype=jnp.bfloat16):
    """Zero-pad params to lane-friendly shapes once.

    Weights are stored in `param_dtype` (bf16 by default: halves DMA, hits the
    bf16 MXU rate on v6e/v7x).  Biases stay f32 since bias-add/ReLU run on the
    f32 accumulator.  Zero pad cols/rows contribute nothing: relu(0 + 0) = 0
    feeds zero rows of W2, and padded output columns are never stored.
    """
    w1p = (jnp.zeros((IN_FEATURES, HIDDEN_PAD), param_dtype)
           .at[:, :HIDDEN_SIZE].set(w1.astype(param_dtype)))
    b1p = (jnp.zeros((1, HIDDEN_PAD), jnp.float32)
           .at[:, :HIDDEN_SIZE].set(b1.reshape(1, -1).astype(jnp.float32)))
    w2p = (jnp.zeros((HIDDEN_PAD, W2_LANE_PAD), param_dtype)
           .at[:HIDDEN_SIZE, :OUT_FEATURES].set(w2.astype(param_dtype)))
    b2p = b2.reshape(1, OUT_FEATURES).astype(jnp.float32)
    return w1p, b1p, w2p, b2p


def mlp_forward(x, w1p, b1p, w2p, b2p, *, block_b=2048):
    """x: (B, 10). Params from prepare_params. Returns (B, 2) f32."""
    B = x.shape[0]
    x = x.astype(w1p.dtype)   # match MXU operand dtype (bf16 on the fast path)

    # Batch tile: multiple of 8 (sublane), capped at block_b, and capped at
    # ceil(B/2) rounded up to 8 so the grid has >= 2 steps whenever possible
    # (lets the "parallel" axis shard across both v7x TensorCores).
    # block_b = 2048 keeps the per-tile VMEM footprint (~<10 MiB incl. the
    # lane-padded x double-buffers and the (bt,512) f32 h intermediate) inside
    # even v5e's scoped VMEM once vmem_limit_bytes is raised below.
    half = -(-B // 2)
    bt = min(block_b, max(8, ((half + 7) // 8) * 8))
    grid = (pl.cdiv(B, bt),)   # ragged last tile -> Pallas boundary-block handling

    # De-padded cost hint for XLA's scheduler.
    x_item = jnp.dtype(x.dtype).itemsize
    p_item = jnp.dtype(w1p.dtype).itemsize
    flops = 2 * B * (IN_FEATURES * HIDDEN_SIZE + HIDDEN_SIZE * OUT_FEATURES)
    bytes_accessed = (B * IN_FEATURES * x_item
                      + (w1p.size + w2p.size) * p_item
                      + (b1p.size + b2p.size) * 4
                      + B * OUT_FEATURES * 4)

    return pl.pallas_call(
        mlp_kernel,
        out_shape=jax.ShapeDtypeStruct((B, OUT_FEATURES), jnp.float32),
        grid=grid,
        in_specs=[
            # x: tiled along batch; last dim (10) equals full array dim -> allowed
            pl.BlockSpec((bt, IN_FEATURES), lambda i: (i, 0)),
            # weights/biases: constant block index -> fetched once, VMEM-resident
            pl.BlockSpec((IN_FEATURES, HIDDEN_PAD), lambda i: (0, 0)),
            pl.BlockSpec((1, HIDDEN_PAD), lambda i: (0, 0)),
            pl.BlockSpec((HIDDEN_PAD, W2_LANE_PAD), lambda i: (0, 0)),
            pl.BlockSpec((1, OUT_FEATURES), lambda i: (0, 0)),
        ],
        # last dim (2) equals the full array dim -> (8,128) rule satisfied
        out_specs=pl.BlockSpec((bt, OUT_FEATURES), lambda i: (i, 0)),
        compiler_params=pltpu.CompilerParams(
            dimension_semantics=("parallel",),          # shard batch tiles across TCs
            vmem_limit_bytes=32 * 1024 * 1024),         # lifts v5e's 16 MiB scoped default
        cost_estimate=pl.CostEstimate(
            flops=flops, transcendentals=0, bytes_accessed=bytes_accessed),
    )(x, w1p, b1p, w2p, b2p)


if __name__ == "__main__":
    key = jax.random.PRNGKey(0)
    k_x, k_w1, k_b1, k_w2, k_b2 = jax.random.split(key, 5)

    # PyTorch-style uniform(-1/sqrt(fan_in), 1/sqrt(fan_in)) init, weights stored
    # as [in, out] (transposed relative to nn.Linear.weight).
    lim1 = 1.0 / (IN_FEATURES ** 0.5)
    w1 = jax.random.uniform(k_w1, (IN_FEATURES, HIDDEN_SIZE),
                            minval=-lim1, maxval=lim1, dtype=jnp.float32)
    b1 = jax.random.uniform(k_b1, (HIDDEN_SIZE,),
                            minval=-lim1, maxval=lim1, dtype=jnp.float32)
    lim2 = 1.0 / (HIDDEN_SIZE ** 0.5)
    w2 = jax.random.uniform(k_w2, (HIDDEN_SIZE, OUT_FEATURES),
                            minval=-lim2, maxval=lim2, dtype=jnp.float32)
    b2 = jax.random.uniform(k_b2, (OUT_FEATURES,),
                            minval=-lim2, maxval=lim2, dtype=jnp.float32)

    def ref_fn(xx):
        return jnp.maximum(xx @ w1 + b1, 0.0) @ w2 + b2

    # --- exact correctness check: f32 params, small single-tile batch ---
    B = 8
    x = jax.random.normal(k_x, (B, IN_FEATURES), dtype=jnp.float32)
    params_f32 = prepare_params(w1, b1, w2, b2, param_dtype=jnp.float32)
    out = jax.block_until_ready(mlp_forward(x, *params_f32))
    assert out.shape == (B, OUT_FEATURES)
    assert jnp.allclose(out, ref_fn(x), atol=1e-5, rtol=1e-5)

    # --- bf16 operand perf path, ragged multi-tile grid (no wrapper pad) ---
    B2 = 300
    x2 = jax.random.normal(k_x, (B2, IN_FEATURES), dtype=jnp.float32)
    params_bf16 = prepare_params(w1, b1, w2, b2, param_dtype=jnp.bfloat16)
    out2 = jax.block_until_ready(mlp_forward(x2, *params_bf16, block_b=128))
    assert out2.shape == (B2, OUT_FEATURES)
    # bf16 operands (f32 accumulation) -> loose tolerance vs the f32 reference.
    assert jnp.allclose(out2, ref_fn(x2), atol=5e-2, rtol=5e-2)

    print("KERNEL_OK")
</pallas_src>

<mosaic_0001>
module attributes {stable_mosaic.version = 11 : i64} {
  func.func @mlp_kernel(%arg0: i32, %arg1: memref<8x10xf32, #tpu.memory_space<vmem>>, %arg2: memref<10x512xf32, #tpu.memory_space<vmem>>, %arg3: memref<1x512xf32, #tpu.memory_space<vmem>>, %arg4: memref<512x128xf32, #tpu.memory_space<vmem>>, %arg5: memref<1x2xf32, #tpu.memory_space<vmem>>, %arg6: memref<8x2xf32, #tpu.memory_space<vmem>>) attributes {dimension_semantics = [#tpu.dimension_semantics<parallel>], iteration_bounds = array<i64: 1>, scalar_prefetch = 0 : i64, scratch_operands = 0 : i64, tpu.core_type = #tpu.core_type<tc>, window_params = [{transform_indices = @transform_0, window_bounds = array<i64: 8, 10>}, {pipeline_mode = #tpu.pipeline_mode<synchronous>, transform_indices = @transform_1, window_bounds = array<i64: 10, 512>}, {pipeline_mode = #tpu.pipeline_mode<synchronous>, transform_indices = @transform_2, window_bounds = array<i64: 1, 512>}, {pipeline_mode = #tpu.pipeline_mode<synchronous>, transform_indices = @transform_3, window_bounds = array<i64: 512, 128>}, {pipeline_mode = #tpu.pipeline_mode<synchronous>, transform_indices = @transform_4, window_bounds = array<i64: 1, 2>}, {transform_indices = @transform_5, window_bounds = array<i64: 8, 2>}]} {
    %c0 = arith.constant 0 : index
    %c0_0 = arith.constant 0 : index
    %0 = vector.load %arg1[%c0, %c0_0] : memref<8x10xf32, #tpu.memory_space<vmem>>, vector<8x10xf32>
    %c0_1 = arith.constant 0 : index
    %c0_2 = arith.constant 0 : index
    %1 = vector.load %arg2[%c0_1, %c0_2] : memref<10x512xf32, #tpu.memory_space<vmem>>, vector<10x512xf32>
    %cst = arith.constant dense<0.000000e+00> : vector<8x512xf32>
    %2 = tpu.matmul %0, %1, %cst {dimension_numbers = #tpu.dot_dimension_numbers<[1], [0], [0], [1], [0, 0, 1, 1], [], []>} : vector<8x10xf32>, vector<10x512xf32>, vector<8x512xf32> -> vector<8x512xf32>
    %c0_3 = arith.constant 0 : index
    %c0_4 = arith.constant 0 : index
    %3 = vector.load %arg3[%c0_3, %c0_4] : memref<1x512xf32, #tpu.memory_space<vmem>>, vector<1x512xf32>
    %4 = vector.broadcast %3 : vector<1x512xf32> to vector<8x512xf32>
    %5 = arith.addf %2, %4 : vector<8x512xf32>
    %cst_5 = arith.constant 0.000000e+00 : f32
    %6 = vector.broadcast %cst_5 : f32 to vector<8x512xf32>
    %7 = arith.maximumf %5, %6 : vector<8x512xf32>
    %c0_6 = arith.constant 0 : index
    %c0_7 = arith.constant 0 : index
    %8 = vector.load %arg4[%c0_6, %c0_7] : memref<512x128xf32, #tpu.memory_space<vmem>>, vector<512x128xf32>
    %cst_8 = arith.constant dense<0.000000e+00> : vector<8x128xf32>
    %9 = tpu.matmul %7, %8, %cst_8 {dimension_numbers = #tpu.dot_dimension_numbers<[1], [0], [0], [1], [0, 0, 1, 1], [], []>} : vector<8x512xf32>, vector<512x128xf32>, vector<8x128xf32> -> vector<8x128xf32>
    %10 = vector.extract_strided_slice %9 {offsets = [0, 0], sizes = [8, 2], strides = [1, 1]} : vector<8x128xf32> to vector<8x2xf32>
    %c0_9 = arith.constant 0 : index
    %c0_10 = arith.constant 0 : index
    %11 = vector.load %arg5[%c0_9, %c0_10] : memref<1x2xf32, #tpu.memory_space<vmem>>, vector<1x2xf32>
    %12 = vector.broadcast %11 : vector<1x2xf32> to vector<8x2xf32>
    %13 = arith.addf %10, %12 : vector<8x2xf32>
    %c0_11 = arith.constant 0 : index
    %c0_12 = arith.constant 0 : index
    %14 = vector.load %arg6[%c0_11, %c0_12] : memref<8x2xf32, #tpu.memory_space<vmem>>, vector<8x2xf32>
    tpu.vector_store %arg6[%c0_11, %c0_12], %13 {strides = array<i32>} : memref<8x2xf32, #tpu.memory_space<vmem>>, vector<8x2xf32>,
    return
  }
  func.func @transform_0(%arg0: i32) -> (i32, i32) {
    %c0_i32 = arith.constant 0 : i32
    %c0_i32_0 = arith.constant 0 : i32
    return %arg0, %c0_i32 : i32, i32
  }
  func.func @transform_1(%arg0: i32) -> (i32, i32) {
    %c0_i32 = arith.constant 0 : i32
    %c0_i32_0 = arith.constant 0 : i32
    %c0_i32_1 = arith.constant 0 : i32
    return %c0_i32, %c0_i32_0 : i32, i32
  }
  func.func @transform_2(%arg0: i32) -> (i32, i32) {
    %c0_i32 = arith.constant 0 : i32
    %c0_i32_0 = arith.constant 0 : i32
    %c0_i32_1 = arith.constant 0 : i32
    return %c0_i32, %c0_i32_0 : i32, i32
  }
  func.func @transform_3(%arg0: i32) -> (i32, i32) {
    %c0_i32 = arith.constant 0 : i32
    %c0_i32_0 = arith.constant 0 : i32
    %c0_i32_1 = arith.constant 0 : i32
    return %c0_i32, %c0_i32_0 : i32, i32
  }
  func.func @transform_4(%arg0: i32) -> (i32, i32) {
    %c0_i32 = arith.constant 0 : i32
    %c0_i32_0 = arith.constant 0 : i32
    %c0_i32_1 = arith.constant 0 : i32
    return %c0_i32, %c0_i32_0 : i32, i32
  }
  func.func @transform_5(%arg0: i32) -> (i32, i32) {
    %c0_i32 = arith.constant 0 : i32
    %c0_i32_0 = arith.constant 0 : i32
    return %arg0, %c0_i32 : i32, i32
  }
}

</mosaic_0001>

<bundles_post_ra>
// kernel: tpu_custom_call.1
= control target key start
LH: loop header
LB: loop body
LE: loop exit
PB: predicated region body
PF: predicated region fallthrough
CT: control target
= control target key end

     0   :  { %10 = vsyncpa [#allocation3], 0  ;;  %s540_s0 = inlined_call_operand.hbm [shape: f32[8,10], index: 0, kind: input, shape index: {}]   ;;  %s541_s1 = inlined_call_operand.hbm [shape: f32[10,512], index: 1, kind: input, shape index: {}]   ;;  %s542_s2 = inlined_call_operand.hbm [shape: f32[1,512], index: 2, kind: input, shape index: {}]   ;;  %s543_s3 = inlined_call_operand.hbm [shape: f32[512,128], index: 3, kind: input, shape index: {}]   ;;  %s544_s4 = inlined_call_operand.vmem [shape: f32[1,2], index: 4, kind: input, shape index: {}]   ;;  %s545_s5 = inlined_call_operand.vmem [shape: f32[8,2], index: 5, kind: output, shape index: {}]  }
   0x1   :  { %11 = vsyncpa [#allocation5], 0  ;;  %s28_s20 = sshll.u32 %s541_s1, 4  ;;  %s29_s20 = int_to_ptr.hbm [resolvable:$true] %s28_s20 }
   0x2   :  { %12 = vsyncpa [#allocation8], 0  ;;  %s476_s21 = smov [#allocation4]   ;;  %s18_s25 = sshll.u32 %s540_s0, 4  ;;  %s19_s25 = int_to_ptr.hbm [resolvable:$true] %s18_s25 }
   0x3   :  { %s30_s22 = sshll.u32 %s476_s21, 4  ;;  %s477_s26 = smov 512   ;;  %s31_s22 = int_to_ptr.vmem [resolvable:$true] %s30_s22 }
   0x4   :  { %s478_s27 = smov 32   ;;  %s479_s28 = smov [#allocation2]  }
   0x5   :  { %36 = dma.hbm_to_vmem [thread:$0]  %s29_s20, 1024, %s31_s22, [#allocation5], %s477_s26, %s477_s26, %s478_s27  }
   0x6   :  { %s20_s29 = sshll.u32 %s479_s28, 4  ;;  %s42_s7 = sshll.u32 %s542_s2, 4  ;;  %s21_s29 = int_to_ptr.vmem [resolvable:$true] %s20_s29  ;;  %s43_s7 = int_to_ptr.hbm [resolvable:$true] %s42_s7 }
   0x7   :  { %23 = dma.hbm_to_vmem [thread:$0]  %s19_s25, 128, %s21_s29, [#allocation3]  }
   0x8   :  { %s52_s9 = sshll.u32 %s543_s3, 4  ;;  %s480_s10 = smov [#allocation6]   ;;  %s53_s9 = int_to_ptr.hbm [resolvable:$true] %s52_s9 }
   0x9   :  { %s44_s11 = sshll.u32 %s480_s10, 4  ;;  %s481_s0 = smov [#allocation7]   ;;  %s45_s11 = int_to_ptr.vmem [resolvable:$true] %s44_s11 }
   0xa   :  { %47 = dma.hbm_to_vmem [thread:$0]  %s43_s7, 64, %s45_s11, [#allocation5]  }
   0xb   :  { %s54_s12 = sshll.u32 %s481_s0, 4  ;;  %s482_s13 = smov 128   ;;  %s55_s12 = int_to_ptr.vmem [resolvable:$true] %s54_s12 }
   0xc   :  { %s483_s14 = smov 8  }
   0xd   :  { %60 = dma.hbm_to_vmem [thread:$0]  %s53_s9, 8192, %s55_s12, [#allocation8], %s482_s13, %s482_s13, %s483_s14  }
   0xe   :  { %470 = dma.done.wait [#allocation3], 128  }
   0xf   :  { %471 = vsyncadd [#allocation3], 4294967168 }
  0x10   :  { %472 = dma.done.wait [#allocation5], 1088  }
  0x11   :  { %473 = vsyncadd [#allocation5], 4294966208 }
  0x12   :  { %474 = dma.done.wait [#allocation8], 8192  }
  0x13   :  { %475 = vsyncadd [#allocation8], 4294959104  ;;  %vm102_vm0 = vcmask 1041408   ;;  %v86_v0 = vld [vmem:[#allocation4 + $0x30] sm:$0x3]  ;;  %v79_v3 = vld [vmem:[#allocation2] sm:$0xff] }
  0x14   :  { %v82_v1 = vld [vmem:[#allocation4 + $0x10] sm:$0xff]  ;;  %v87_v2 = vld [vmem:[#allocation4 + $0x38] sm:$0x3]  ;;  %361 = vmatpush.msk.msra.mxu2 %vm102_vm0, %v86_v0  ;;  %vm98_vm1 = vcmask 80896   ;;  %v84_v5 = vld [vmem:[#allocation4 + $0x20] sm:$0x3] }
  0x15   :  { %363 = vmatpush.msk.msra.mxu3 %vm102_vm0, %v87_v2  ;;  %v83_v4 = vld [vmem:[#allocation4 + $0x18] sm:$0xff]  ;;  %357 = vmatpush.msk.msra.mxu0 %vm102_vm0, %v84_v5  ;;  %v85_v6 = vld [vmem:[#allocation4 + $0x28] sm:$0x3]  ;;  %v80_v7 = vld [vmem:[#allocation4] sm:$0xff]  ;;  %vm348_vm2 = vcmask 15360  }
  0x16   :  { %170 = vmatpush.msra.mxu2 %v82_v1  ;;  %v246_v8 = vld [vmem:[#allocation7 + $0x178] sm:$0xff]  ;;  %v81_v9 = vld [vmem:[#allocation4 + $0x8] sm:$0xff]  ;;  %359 = vmatpush.msk.msra.mxu1 %vm102_vm0, %v85_v6  ;;  %v245_v11 = vld [vmem:[#allocation7 + $0x170] sm:$0xff] }
  0x17   :  { %190 = vmatpush.msra.mxu3 %v83_v4  ;;  %362 = vmatmul.msk.f32.vlgmr.msra.gmra.mxu2 %vm98_vm1, %v79_v3  ;;  %v262_v10 = vld [vmem:[#allocation7 + $0x1f8] sm:$0xff]  ;;  %v244_v14 = vld [vmem:[#allocation7 + $0x168] sm:$0xff]  ;;  %v261_v15 = vld [vmem:[#allocation7 + $0x1f0] sm:$0xff] }
  0x18   :  { %364 = vmatmul.msk.f32.vlgmr.msra.gmra.mxu3 %vm98_vm1, %v79_v3  ;;  %130 = vmatpush.msra.mxu0 %v80_v7  ;;  %v214_v12 = vld [vmem:[#allocation7 + $0x78] sm:$0xff]  ;;  %v213_v16 = vld [vmem:[#allocation7 + $0x70] sm:$0xff]  ;;  %v243_v18 = vld [vmem:[#allocation7 + $0x160] sm:$0xff] }
  0x19   :  { %358 = vmatmul.msk.f32.vlgmr.msra.gmra.mxu0 %vm98_vm1, %v79_v3  ;;  %303 = vmatpush.msrb.mxu2 %v246_v8  ;;  %v230_v13 = vld [vmem:[#allocation7 + $0xf8] sm:$0xff]  ;;  %v229_v17 = vld [vmem:[#allocation7 + $0xf0] sm:$0xff]  ;;  %v260_v19 = vld [vmem:[#allocation7 + $0x1e8] sm:$0xff] }
  0x1a   :  { %150 = vmatpush.msra.mxu1 %v81_v9  ;;  %323 = vmatpush.msrb.mxu3 %v262_v10  ;;  %v212_v20 = vld [vmem:[#allocation7 + $0x68] sm:$0xff]  ;;  %v242_v22 = vld [vmem:[#allocation7 + $0x158] sm:$0xff]  ;;  %v259_v23 = vld [vmem:[#allocation7 + $0x1e0] sm:$0xff] }
  0x1b   :  { %360 = vmatmul.msk.f32.vlgmr.msra.gmra.mxu1 %vm98_vm1, %v79_v3  ;;  %304 = vmatpush.msrb.mxu2 %v245_v11  ;;  %v228_v21 = vld [vmem:[#allocation7 + $0xe8] sm:$0xff]  ;;  %v211_v24 = vld [vmem:[#allocation7 + $0x60] sm:$0xff]  ;;  %v241_v26 = vld [vmem:[#allocation7 + $0x150] sm:$0xff] }
  0x1c   :  { %263 = vmatpush.msrb.mxu0 %v214_v12  ;;  %283 = vmatpush.msrb.mxu1 %v230_v13  ;;  %v227_v25 = vld [vmem:[#allocation7 + $0xe0] sm:$0xff]  ;;  %v258_v27 = vld [vmem:[#allocation7 + $0x1d8] sm:$0xff]  ;;  %v240_v30 = vld [vmem:[#allocation7 + $0x148] sm:$0xff] }
  0x1d   :  { %305 = vmatpush.msrb.mxu2 %v244_v14  ;;  %324 = vmatpush.msrb.mxu3 %v261_v15  ;;  %v210_v28 = vld [vmem:[#allocation7 + $0x58] sm:$0xff]  ;;  %v257_v31 = vld [vmem:[#allocation7 + $0x1d0] sm:$0xff]  ;;  %v239_v34 = vld [vmem:[#allocation7 + $0x140] sm:$0xff] }
  0x1e   :  { %264 = vmatpush.msrb.mxu0 %v213_v16  ;;  %284 = vmatpush.msrb.mxu1 %v229_v17  ;;  %v226_v29 = vld [vmem:[#allocation7 + $0xd8] sm:$0xff]  ;;  %v209_v32 = vld [vmem:[#allocation7 + $0x50] sm:$0xff]  ;;  %v256_v35 = vld [vmem:[#allocation7 + $0x1c8] sm:$0xff] }
  0x1f   :  { %306 = vmatpush.msrb.mxu2 %v243_v18  ;;  %325 = vmatpush.msrb.mxu3 %v260_v19  ;;  %v225_v33 = vld [vmem:[#allocation7 + $0xd0] sm:$0xff]  ;;  %v208_v36 = vld [vmem:[#allocation7 + $0x48] sm:$0xff]  ;;  %v238_v38 = vld [vmem:[#allocation7 + $0x138] sm:$0xff] }
  0x20   :  { %265 = vmatpush.msrb.mxu0 %v212_v20  ;;  %285 = vmatpush.msrb.mxu1 %v228_v21  ;;  %v224_v37 = vld [vmem:[#allocation7 + $0xc8] sm:$0xff]  ;;  %v255_v39 = vld [vmem:[#allocation7 + $0x1c0] sm:$0xff]  ;;  %v237_v42 = vld [vmem:[#allocation7 + $0x130] sm:$0xff] }
  0x21   :  { %307 = vmatpush.msrb.mxu2 %v242_v22  ;;  %326 = vmatpush.msrb.mxu3 %v259_v23  ;;  %v207_v40 = vld [vmem:[#allocation7 + $0x40] sm:$0xff]  ;;  %v254_v43 = vld [vmem:[#allocation7 + $0x1b8] sm:$0xff]  ;;  %v236_v46 = vld [vmem:[#allocation7 + $0x128] sm:$0xff] }
  0x22   :  { %266 = vmatpush.msrb.mxu0 %v211_v24  ;;  %286 = vmatpush.msrb.mxu1 %v227_v25  ;;  %v223_v41 = vld [vmem:[#allocation7 + $0xc0] sm:$0xff]  ;;  %v206_v44 = vld [vmem:[#allocation7 + $0x38] sm:$0xff]  ;;  %v253_v47 = vld [vmem:[#allocation7 + $0x1b0] sm:$0xff] }
  0x23   :  { %308 = vmatpush.msrb.mxu2 %v241_v26  ;;  %327 = vmatpush.msrb.mxu3 %v258_v27  ;;  %v222_v45 = vld [vmem:[#allocation7 + $0xb8] sm:$0xff]  ;;  %v205_v48 = vld [vmem:[#allocation7 + $0x30] sm:$0xff]  ;;  %v235_v50 = vld [vmem:[#allocation7 + $0x120] sm:$0xff] }
  0x24   :  { %267 = vmatpush.msrb.mxu0 %v210_v28  ;;  %287 = vmatpush.msrb.mxu1 %v226_v29  ;;  %v221_v49 = vld [vmem:[#allocation7 + $0xb0] sm:$0xff]  ;;  %v252_v51 = vld [vmem:[#allocation7 + $0x1a8] sm:$0xff]  ;;  %v234_v54 = vld [vmem:[#allocation7 + $0x118] sm:$0xff] }
  0x25   :  { %309 = vmatpush.msrb.mxu2 %v240_v30  ;;  %328 = vmatpush.msrb.mxu3 %v257_v31  ;;  %v204_v52 = vld [vmem:[#allocation7 + $0x28] sm:$0xff]  ;;  %v251_v55 = vld [vmem:[#allocation7 + $0x1a0] sm:$0xff]  ;;  %v233_v58 = vld [vmem:[#allocation7 + $0x110] sm:$0xff] }
  0x26   :  { %268 = vmatpush.msrb.mxu0 %v209_v32  ;;  %288 = vmatpush.msrb.mxu1 %v225_v33  ;;  %v220_v53 = vld [vmem:[#allocation7 + $0xa8] sm:$0xff]  ;;  %v203_v56 = vld [vmem:[#allocation7 + $0x20] sm:$0xff]  ;;  %v250_v59 = vld [vmem:[#allocation7 + $0x198] sm:$0xff] }
  0x27   :  { %310 = vmatpush.msrb.mxu2 %v239_v34  ;;  %329 = vmatpush.msrb.mxu3 %v256_v35  ;;  %v219_v57 = vld [vmem:[#allocation7 + $0xa0] sm:$0xff]  ;;  %v202_v60 = vld [vmem:[#allocation7 + $0x18] sm:$0xff]  ;;  %v232_v62 = vld [vmem:[#allocation7 + $0x108] sm:$0xff] }
  0x28   :  { %269 = vmatpush.msrb.mxu0 %v208_v36  ;;  %289 = vmatpush.msrb.mxu1 %v224_v37  ;;  %v218_v61 = vld [vmem:[#allocation7 + $0x98] sm:$0xff]  ;;  %v249_v63 = vld [vmem:[#allocation7 + $0x190] sm:$0xff]  ;;  %v231_v2 = vld [vmem:[#allocation7 + $0x100] sm:$0xff] }
  0x29   :  { %311 = vmatpush.msrb.mxu2 %v238_v38  ;;  %330 = vmatpush.msrb.mxu3 %v255_v39  ;;  %v201_v0 = vld [vmem:[#allocation7 + $0x10] sm:$0xff]  ;;  %v248_v3 = vld [vmem:[#allocation7 + $0x188] sm:$0xff]  ;;  %v247_v6 = vld [vmem:[#allocation7 + $0x180] sm:$0xff] }
  0x2a   :  { %270 = vmatpush.msrb.mxu0 %v207_v40  ;;  %290 = vmatpush.msrb.mxu1 %v223_v41  ;;  %v217_v1 = vld [vmem:[#allocation7 + $0x90] sm:$0xff]  ;;  %v200_v4 = vld [vmem:[#allocation7 + $0x8] sm:$0xff]  ;;  %v199_v7 = vld [vmem:[#allocation7] sm:$0xff] }
  0x2b   :  { %312 = vmatpush.msrb.mxu2 %v237_v42  ;;  %331 = vmatpush.msrb.mxu3 %v254_v43  ;;  %v216_v5 = vld [vmem:[#allocation7 + $0x88] sm:$0xff]  ;;  %v215_v8 = vld [vmem:[#allocation7 + $0x80] sm:$0xff]  ;;  %v88_v9 = vld [vmem:[#allocation6] sm:$0xf] }
  0x2c   :  { %271 = vmatpush.msrb.mxu0 %v206_v44  ;;  %291 = vmatpush.msrb.mxu1 %v222_v45  ;;  %v90_v10 = vperm.slane %v88_v9, 0  ;;  %v91_v11 = vperm.slane %v88_v9, 1  ;;  %v92_v13 = vperm.slane %v88_v9, 2  ;;  %v93_v14 = vperm.slane %v88_v9, 3  ;;  %v373_v32 = vld [vmem:[%s544_s4] ss:$0 sm:$0xff] }
  0x2d   :  { %313 = vmatpush.msrb.mxu2 %v236_v46  ;;  %332 = vmatpush.msrb.mxu3 %v253_v47 }
  0x2e   :  { %272 = vmatpush.msrb.mxu0 %v205_v48  ;;  %292 = vmatpush.msrb.mxu1 %v221_v49 }
  0x2f   :  { %314 = vmatpush.msrb.mxu2 %v235_v50  ;;  %333 = vmatpush.msrb.mxu3 %v252_v51 }
  0x30   :  { %273 = vmatpush.msrb.mxu0 %v204_v52  ;;  %293 = vmatpush.msrb.mxu1 %v220_v53 }
  0x31   :  { %315 = vmatpush.msrb.mxu2 %v234_v54  ;;  %334 = vmatpush.msrb.mxu3 %v251_v55 }
  0x32   :  { %274 = vmatpush.msrb.mxu0 %v203_v56  ;;  %294 = vmatpush.msrb.mxu1 %v219_v57 }
  0x33   :  { %316 = vmatpush.msrb.mxu2 %v233_v58  ;;  %335 = vmatpush.msrb.mxu3 %v250_v59 }
  0x34   :  { %275 = vmatpush.msrb.mxu0 %v202_v60  ;;  %295 = vmatpush.msrb.mxu1 %v218_v61 }
  0x35   :  { %317 = vmatpush.msrb.mxu2 %v232_v62  ;;  %336 = vmatpush.msrb.mxu3 %v249_v63 }
  0x36   :  { %276 = vmatpush.msrb.mxu0 %v201_v0  ;;  %296 = vmatpush.msrb.mxu1 %v217_v1 }
  0x37   :  { %318 = vmatpush.msrb.mxu2 %v231_v2  ;;  %337 = vmatpush.msrb.mxu3 %v248_v3 }
  0x38   :  { %277 = vmatpush.msrb.mxu0 %v200_v4  ;;  %297 = vmatpush.msrb.mxu1 %v216_v5 }
  0x39   :  { %338 = vmatpush.msrb.mxu3 %v247_v6 }
  0x3a   :  { %278 = vmatpush.msrb.mxu0 %v199_v7  ;;  %298 = vmatpush.msrb.mxu1 %v215_v8 }
  0x96   :  { %v132_v12 = vpop.f32.mrf.mxu0 }
  0x97   :  { %v133_v15 = vadd.f32 %v132_v12, %v90_v10 }
  0x98   :  { %v152_v16 = vpop.f32.mrf.mxu1 }
  0x99   :  { %v195_v17 = vmax.f32 %v133_v15, 0.0  ;;  %v153_v18 = vadd.f32 %v152_v16, %v91_v11 }
  0x9a   :  { %v172_v19 = vpop.f32.mrf.mxu2 }
  0x9b   :  { %v192_v20 = vpop.f32.mrf.mxu3  ;;  %v173_v21 = vadd.f32 %v172_v19, %v92_v13  ;;  %v196_v23 = vmax.f32 %v153_v18, 0.0  ;;  %279 = vmatmul.f32.vlgmr.msrb.gmra.mxu0 %v195_v17 }
  0x9c   :  { %v193_v22 = vadd.f32 %v192_v20, %v93_v14 }
  0x9d   :  { %v197_v24 = vmax.f32 %v173_v21, 0.0  ;;  %299 = vmatmul.f32.vlgmr.msrb.gmra.mxu1 %v196_v23 }
  0x9e   :  { %v198_v25 = vmax.f32 %v193_v22, 0.0 }
  0x9f   :  { %319 = vmatmul.f32.vlgmr.msrb.gmra.mxu2 %v197_v24 }
  0xa0   :  { %339 = vmatmul.f32.vlgmr.msrb.gmra.mxu3 %v198_v25 }
 0x118   :  { %v280_v26 = vpop.f32.mrf.mxu0 }
 0x11a   :  { %v300_v27 = vpop.f32.mrf.mxu1 }
 0x11b   :  { %v301_v28 = vadd.f32 %v300_v27, %v280_v26 }
 0x122   :  { %v320_v29 = vpop.f32.mrf.mxu2 }
 0x123   :  { %v340_v30 = vpop.f32.mrf.mxu3  ;;  %v321_v31 = vadd.f32 %v320_v29, %v301_v28 }
 0x125   :  { %v341_v33 = vadd.f32 %v340_v30, %v321_v31 }
 0x127   :  { %v347_v34 = vadd.f32 %v373_v32, %v341_v33 }
 0x129   :  { %349 = vst.msk [vmem:[%s545_s5] sm:$0xff] %vm348_vm2, %v347_v34 }
 0x12a   :  { %354 = vsyncpa [#allocation3], 1 }
 0x12b   :  { %355 = vsyncpa [#allocation5], 1 }
 0x12c   :  { %356 = vsyncpa [#allocation8], 1 }

</bundles_post_ra>
